<compile_context>
chip_gen: v6e
topology: v6e:2x2x1
jax: 0.10.0
libtpu: 0.0.40
codegen_flags: <defaults>
</compile_context>

<pallas_src>
import functools

import numpy as np
import jax
import jax.numpy as jnp
from jax.experimental import pallas as pl
from jax.experimental.pallas import tpu as pltpu


def make_blur_taps(kernel=(1, 2, 1), normalize=True, flip=False):
    """Separable 1-D taps f such that the module's 3x3 kernel == outer(f, f).

    BlurLayer builds K = outer(k1, k1); normalize divides by sum(K) = sum(k1)^2,
    which is the same as normalizing k1 by sum(k1); flip reverses both axes,
    i.e. reverses the 1-D taps.
    """
    k1 = np.array(kernel, dtype=np.float32).reshape(-1)
    if normalize:
        k1 = k1 / np.sum(k1)
    if flip:
        k1 = k1[::-1]
    return tuple(float(v) for v in k1)


def _pick_block_channels(nc, h, w, budget_bytes=1 << 20):
    """Largest divisor of nc whose f32 input block is <= budget_bytes."""
    plane_bytes = h * w * 4
    target = max(1, budget_bytes // max(plane_bytes, 1))
    cb = 1
    for d in range(1, nc + 1):
        if nc % d == 0 and d <= target:
            cb = d
    return cb


def _blur_block_kernel(x_ref, o_ref, *, taps, H, W):
    """Depthwise 3x3 blur on a (CB, H, W) block with in-kernel zero halo.

    out[c, i, j] = sum_{a,b} f[a]*f[b] * x[c, i+a-1, j+b-1]   (zero outside)
    computed as a separable horizontal pass followed by a vertical pass.
    """
    f0, f1, f2 = taps
    x = x_ref[...].astype(jnp.float32)                 # (CB, H, W)
    cb = x.shape[0]

    # Horizontal 3-tap pass (lane axis), zero halo via concat.
    zc = jnp.zeros((cb, H, 1), jnp.float32)
    xh = jnp.concatenate([zc, x, zc], axis=-1)         # (CB, H, W+2)
    h = (f0 * xh[:, :, 0:W]
         + f1 * xh[:, :, 1:W + 1]
         + f2 * xh[:, :, 2:W + 2])                     # (CB, H, W)

    # Vertical 3-tap pass (sublane axis), zero halo via concat.
    zr = jnp.zeros((cb, 1, W), jnp.float32)
    hv = jnp.concatenate([zr, h, zr], axis=-2)         # (CB, H+2, W)
    out = (f0 * hv[:, 0:H, :]
           + f1 * hv[:, 1:H + 1, :]
           + f2 * hv[:, 2:H + 2, :])                   # (CB, H, W)

    o_ref[...] = out.astype(o_ref.dtype)


def blur_layer(x, kernel=(1, 2, 1), normalize=True, flip=False):
    """x: (N, C, H, W). Returns the BlurLayer forward (depthwise 3x3, pad=1)."""
    N, C, H, W = x.shape
    taps = make_blur_taps(kernel, normalize, flip)

    NC = N * C
    xf = x.reshape(NC, H, W)                           # free reshape (contiguous)
    CB = _pick_block_channels(NC, H, W)
    grid = (NC // CB,)

    kern = functools.partial(_blur_block_kernel, taps=taps, H=H, W=W)

    out = pl.pallas_call(
        kern,
        out_shape=jax.ShapeDtypeStruct((NC, H, W), x.dtype),
        grid=grid,
        in_specs=[pl.BlockSpec((CB, H, W), lambda i: (i, 0, 0))],
        out_specs=pl.BlockSpec((CB, H, W), lambda i: (i, 0, 0)),
        compiler_params=pltpu.CompilerParams(
            dimension_semantics=("parallel",)),
    )(xf)
    return out.reshape(N, C, H, W)


def blur_layer_ref(x, kernel=(1, 2, 1), normalize=True, flip=False):
    """Pure-JAX reference: depthwise conv2d, stride 1, padding 1."""
    taps = make_blur_taps(kernel, normalize, flip)
    k3 = jnp.asarray(np.outer(np.array(taps), np.array(taps)), jnp.float32)
    N, C, H, W = x.shape
    w = jnp.tile(k3[None, None, :, :], (C, 1, 1, 1))   # (C, 1, 3, 3)
    return jax.lax.conv_general_dilated(
        x, w,
        window_strides=(1, 1),
        padding=((1, 1), (1, 1)),
        dimension_numbers=("NCHW", "OIHW", "NCHW"),
        feature_group_count=C,
    )


if __name__ == "__main__":
    N, C, H, W = 2, 4, 16, 16
    key = jax.random.PRNGKey(0)
    x = jax.random.normal(key, (N, C, H, W), dtype=jnp.float32)

    out = blur_layer(x, kernel=(1, 2, 1), normalize=True, flip=False)
    out = jax.block_until_ready(out)

    ref = jax.block_until_ready(
        blur_layer_ref(x, kernel=(1, 2, 1), normalize=True, flip=False))
    np.testing.assert_allclose(np.asarray(out), np.asarray(ref),
                               rtol=1e-5, atol=1e-5)
    print("KERNEL_OK")
</pallas_src>

<mosaic_0001>
module attributes {stable_mosaic.version = 11 : i64} {
  func.func @_blur_block_kernel(%arg0: i32, %arg1: memref<8x16x16xf32, #tpu.memory_space<vmem>>, %arg2: memref<8x16x16xf32, #tpu.memory_space<vmem>>) attributes {dimension_semantics = [#tpu.dimension_semantics<parallel>], iteration_bounds = array<i64: 1>, scalar_prefetch = 0 : i64, scratch_operands = 0 : i64, tpu.core_type = #tpu.core_type<tc>, window_params = [{transform_indices = @transform_0, window_bounds = array<i64: 8, 16, 16>}, {transform_indices = @transform_1, window_bounds = array<i64: 8, 16, 16>}]} {
    %c0 = arith.constant 0 : index
    %c0_0 = arith.constant 0 : index
    %c0_1 = arith.constant 0 : index
    %0 = vector.load %arg1[%c0, %c0_0, %c0_1] : memref<8x16x16xf32, #tpu.memory_space<vmem>>, vector<8x16x16xf32>
    %cst = arith.constant 0.000000e+00 : f32
    %1 = vector.broadcast %cst : f32 to vector<8x16x1xf32>
    %2 = tpu.concatenate %1, %0, %1 in 2 : vector<8x16x1xf32>, vector<8x16x16xf32>, vector<8x16x1xf32> -> vector<8x16x18xf32>
    %3 = vector.extract_strided_slice %2 {offsets = [0, 0, 0], sizes = [8, 16, 16], strides = [1, 1, 1]} : vector<8x16x18xf32> to vector<8x16x16xf32>
    %cst_2 = arith.constant 2.500000e-01 : f32
    %4 = vector.broadcast %cst_2 : f32 to vector<8x16x16xf32>
    %5 = arith.mulf %4, %3 : vector<8x16x16xf32>
    %6 = vector.extract_strided_slice %2 {offsets = [0, 0, 1], sizes = [8, 16, 16], strides = [1, 1, 1]} : vector<8x16x18xf32> to vector<8x16x16xf32>
    %cst_3 = arith.constant 5.000000e-01 : f32
    %7 = vector.broadcast %cst_3 : f32 to vector<8x16x16xf32>
    %8 = arith.mulf %7, %6 : vector<8x16x16xf32>
    %9 = arith.addf %5, %8 : vector<8x16x16xf32>
    %10 = vector.extract_strided_slice %2 {offsets = [0, 0, 2], sizes = [8, 16, 16], strides = [1, 1, 1]} : vector<8x16x18xf32> to vector<8x16x16xf32>
    %cst_4 = arith.constant 2.500000e-01 : f32
    %11 = vector.broadcast %cst_4 : f32 to vector<8x16x16xf32>
    %12 = arith.mulf %11, %10 : vector<8x16x16xf32>
    %13 = arith.addf %9, %12 : vector<8x16x16xf32>
    %cst_5 = arith.constant 0.000000e+00 : f32
    %14 = vector.broadcast %cst_5 : f32 to vector<8x1x16xf32>
    %15 = tpu.concatenate %14, %13, %14 in 1 : vector<8x1x16xf32>, vector<8x16x16xf32>, vector<8x1x16xf32> -> vector<8x18x16xf32>
    %16 = vector.extract_strided_slice %15 {offsets = [0, 0, 0], sizes = [8, 16, 16], strides = [1, 1, 1]} : vector<8x18x16xf32> to vector<8x16x16xf32>
    %cst_6 = arith.constant 2.500000e-01 : f32
    %17 = vector.broadcast %cst_6 : f32 to vector<8x16x16xf32>
    %18 = arith.mulf %17, %16 : vector<8x16x16xf32>
    %19 = vector.extract_strided_slice %15 {offsets = [0, 1, 0], sizes = [8, 16, 16], strides = [1, 1, 1]} : vector<8x18x16xf32> to vector<8x16x16xf32>
    %cst_7 = arith.constant 5.000000e-01 : f32
    %20 = vector.broadcast %cst_7 : f32 to vector<8x16x16xf32>
    %21 = arith.mulf %20, %19 : vector<8x16x16xf32>
    %22 = arith.addf %18, %21 : vector<8x16x16xf32>
    %23 = vector.extract_strided_slice %15 {offsets = [0, 2, 0], sizes = [8, 16, 16], strides = [1, 1, 1]} : vector<8x18x16xf32> to vector<8x16x16xf32>
    %cst_8 = arith.constant 2.500000e-01 : f32
    %24 = vector.broadcast %cst_8 : f32 to vector<8x16x16xf32>
    %25 = arith.mulf %24, %23 : vector<8x16x16xf32>
    %26 = arith.addf %22, %25 : vector<8x16x16xf32>
    %c0_9 = arith.constant 0 : index
    %c0_10 = arith.constant 0 : index
    %c0_11 = arith.constant 0 : index
    %27 = vector.load %arg2[%c0_9, %c0_10, %c0_11] : memref<8x16x16xf32, #tpu.memory_space<vmem>>, vector<8x16x16xf32>
    tpu.vector_store %arg2[%c0_9, %c0_10, %c0_11], %26 {strides = array<i32>} : memref<8x16x16xf32, #tpu.memory_space<vmem>>, vector<8x16x16xf32>,
    return
  }
  func.func @transform_0(%arg0: i32) -> (i32, i32, i32) {
    %c0_i32 = arith.constant 0 : i32
    %c0_i32_0 = arith.constant 0 : i32
    %c0_i32_1 = arith.constant 0 : i32
    return %arg0, %c0_i32, %c0_i32_0 : i32, i32, i32
  }
  func.func @transform_1(%arg0: i32) -> (i32, i32, i32) {
    %c0_i32 = arith.constant 0 : i32
    %c0_i32_0 = arith.constant 0 : i32
    %c0_i32_1 = arith.constant 0 : i32
    return %arg0, %c0_i32, %c0_i32_0 : i32, i32, i32
  }
}

</mosaic_0001>

<bundles_post_ra>
// kernel: tpu_custom_call.1
= control target key start
LH: loop header
LB: loop body
LE: loop exit
PB: predicated region body
PF: predicated region fallthrough
CT: control target
= control target key end

     0   :  { %6 = vsyncpa [#allocation3], 0  ;;  %s960_s0 = inlined_call_operand.hbm [shape: f32[8,16,16], index: 0, kind: input, shape index: {}]   ;;  %s961_s1 = inlined_call_operand.hbm [shape: f32[8,16,16], index: 1, kind: output, shape index: {}]  }
   0x1   :  { %7 = vsyncpa [#allocation4], 0  ;;  %s737_s6 = smov [#allocation2]  }
   0x2   :  { %s13_s7 = sshll.u32 %s737_s6, 4  ;;  %s14_s7 = int_to_ptr.vmem [resolvable:$true] %s13_s7 }
   0x3   :  { %s701_s8 = scalar_lea.vmem %s14_s7, 2048  ;;  %p706_p1 = scmp.lt.s32.totalorder %s14_s7, %s14_s7 }
   0x4   :  { %p702_p0 = scmp.ne.s32.totalorder %s14_s7, %s701_s8  ;;  %p707_p2 = scmp.lt.s32.totalorder %s701_s8, %s701_s8 }
   0x6   :  { %p708_p3 = por %p707_p2, %p706_p1 }
   0x8   :  { %p709_p4 = pnand %p708_p3, %p702_p0 }
   0xa   :  { %712 = shalt.err (!%p709_p4)
}
   0xb   :  { %s738_s9 = smov 128   ;;  %s739_s10 = smov 8  }
   0xc   :  { %19 = dma.hbm_to_vmem [thread:$0]  %s960_s0, 2048, %s14_s7, [#allocation3], %s738_s9, %s738_s9, %s739_s10  }
   0xd   :  { %733 = dma.done.wait [#allocation3], 2048  }
   0xe   :  { %734 = vsyncadd [#allocation3], 4294965248  ;;  %v23_v0 = vld [vmem:[#allocation2] sm:$0xff]  ;;  %v25_v1 = vld [vmem:[#allocation2 + $0x10] sm:$0xff]  ;;  %s740_s13 = smov 1   ;;  %vm103_vm0 = vcmask 7168  }
   0xf   :  { %55 = vrot.lane.b32.xlu0 %v23_v0, %s740_s13  ;;  %59 = vrot.lane.b32.xlu1 %v25_v1, %s740_s13  ;;  %v24_v2 = vld [vmem:[#allocation2 + $0x8] sm:$0xff]  ;;  %v26_v3 = vld [vmem:[#allocation2 + $0x18] sm:$0xff]  ;;  %v27_v4 = vld [vmem:[#allocation2 + $0x20] sm:$0xff]  ;;  %vm120_vm1 = vcmask 138240   ;;  %s741_s0 = smov 127   ;;  %s742_s14 = smov 126  }
  0x10   :  { %v28_v5 = vld [vmem:[#allocation2 + $0x28] sm:$0xff]  ;;  %v29_v6 = vld [vmem:[#allocation2 + $0x30] sm:$0xff]  ;;  %v30_v7 = vld [vmem:[#allocation2 + $0x38] sm:$0xff]  ;;  %vm345_vm2 = vcmask 1040384   ;;  %vm474_vm3 = vcmask 1046528   ;;  %vm579_vm4 = vcmask 1045504  }
  0x11   :  { %v31_v8 = vld [vmem:[#allocation2 + $0x40] sm:$0xff]  ;;  %v32_v9 = vld [vmem:[#allocation2 + $0x48] sm:$0xff]  ;;  %v33_v10 = vld [vmem:[#allocation2 + $0x50] sm:$0xff]  ;;  %vm652_vm5 = vcmask 130048   ;;  %s743_s15 = smov [#allocation5]  }
  0x12   :  { %v34_v11 = vld [vmem:[#allocation2 + $0x58] sm:$0xff]  ;;  %v35_v12 = vld [vmem:[#allocation2 + $0x60] sm:$0xff]  ;;  %v36_v13 = vld [vmem:[#allocation2 + $0x68] sm:$0xff]  ;;  %s674_s16 = sshll.u32 %s743_s15, 4  ;;  %s675_s16 = int_to_ptr.vmem [resolvable:$true] %s674_s16 }
  0x13   :  { %57 = vrot.lane.b32.xlu0 %v24_v2, %s740_s13  ;;  %61 = vrot.lane.b32.xlu1 %v26_v3, %s740_s13  ;;  %v37_v14 = vld [vmem:[#allocation2 + $0x70] sm:$0xff]  ;;  %v38_v15 = vld [vmem:[#allocation2 + $0x78] sm:$0xff]  ;;  %s713_s17 = scalar_lea.vmem %s675_s16, 2048  ;;  %p718_p6 = scmp.lt.s32.totalorder %s675_s16, %s675_s16 }
  0x14   :  { %p714_p5 = scmp.ne.s32.totalorder %s675_s16, %s713_s17  ;;  %p719_p7 = scmp.lt.s32.totalorder %s713_s17, %s713_s17 }
  0x16   :  { %p720_p8 = por %p719_p7, %p718_p6 }
  0x17   :  { %63 = vrot.lane.b32.xlu0 %v27_v4, %s740_s13  ;;  %65 = vrot.lane.b32.xlu1 %v28_v5, %s740_s13 }
  0x18   :  { %p721_p9 = pnand %p720_p8, %p714_p5 }
  0x1b   :  { %67 = vrot.lane.b32.xlu0 %v29_v6, %s740_s13  ;;  %69 = vrot.lane.b32.xlu1 %v30_v7, %s740_s13 }
  0x1f   :  { %71 = vrot.lane.b32.xlu0 %v31_v8, %s740_s13  ;;  %73 = vrot.lane.b32.xlu1 %v32_v9, %s740_s13 }
  0x23   :  { %75 = vrot.lane.b32.xlu0 %v33_v10, %s740_s13  ;;  %77 = vrot.lane.b32.xlu1 %v34_v11, %s740_s13 }
  0x27   :  { %79 = vrot.lane.b32.xlu0 %v35_v12, %s740_s13  ;;  %81 = vrot.lane.b32.xlu1 %v36_v13, %s740_s13 }
  0x2b   :  { %83 = vrot.lane.b32.xlu0 %v37_v14, %s740_s13  ;;  %85 = vrot.lane.b32.xlu1 %v38_v15, %s740_s13 }
  0x81   :  { %v56_v16 = vpop.permute.xlu0 %55  ;;  %v60_v17 = vpop.permute.xlu1 %59 }
  0x82   :  { %v104_v18 = vsel %vm103_vm0, 0.0, %v56_v16  ;;  %v106_v19 = vsel %vm103_vm0, 0.0, %v60_v17 }
  0x83   :  { %v763_v20 = vsel %vm120_vm1, %v104_v18, 0.0  ;;  %v766_v21 = vsel %vm120_vm1, %v106_v19, 0.0 }
  0x84   :  { %v153_v22 = vmul.f32 0.5, %v763_v20  ;;  %v155_v25 = vmul.f32 0.5, %v766_v21  ;;  %v137_v16 = vmul.f32 0.25, %v763_v20  ;;  %v139_v17 = vmul.f32 0.25, %v766_v21 }
  0x85   :  { %v58_v23 = vpop.permute.xlu0 %57  ;;  %v62_v24 = vpop.permute.xlu1 %61 }
  0x86   :  { %v105_v26 = vsel %vm103_vm0, 0.0, %v58_v23  ;;  %185 = vrot.lane.b32.xlu0 %v153_v22, %s741_s0  ;;  %v107_v27 = vsel %vm103_vm0, 0.0, %v62_v24 }
  0x87   :  { %v774_v28 = vsel %vm120_vm1, %v105_v26, 0.0  ;;  %v777_v29 = vsel %vm120_vm1, %v107_v27, 0.0 }
  0x88   :  { %v154_v30 = vmul.f32 0.5, %v774_v28  ;;  %v156_v33 = vmul.f32 0.5, %v777_v29  ;;  %v138_v18 = vmul.f32 0.25, %v774_v28  ;;  %v140_v19 = vmul.f32 0.25, %v777_v29 }
  0x89   :  { %v64_v31 = vpop.permute.xlu0 %63  ;;  %v66_v32 = vpop.permute.xlu1 %65 }
  0x8a   :  { %v108_v34 = vsel %vm103_vm0, 0.0, %v64_v31  ;;  %189 = vrot.lane.b32.xlu0 %v155_v25, %s741_s0  ;;  %187 = vrot.lane.b32.xlu1 %v154_v30, %s741_s0  ;;  %v109_v35 = vsel %vm103_vm0, 0.0, %v66_v32 }
  0x8b   :  { %v786_v36 = vsel %vm120_vm1, %v108_v34, 0.0  ;;  %v789_v37 = vsel %vm120_vm1, %v109_v35, 0.0 }
  0x8c   :  { %v157_v38 = vmul.f32 0.5, %v786_v36  ;;  %v158_v41 = vmul.f32 0.5, %v789_v37  ;;  %v141_v22 = vmul.f32 0.25, %v786_v36  ;;  %v142_v20 = vmul.f32 0.25, %v789_v37 }
  0x8d   :  { %v68_v39 = vpop.permute.xlu0 %67  ;;  %v70_v40 = vpop.permute.xlu1 %69 }
  0x8e   :  { %v110_v42 = vsel %vm103_vm0, 0.0, %v68_v39  ;;  %191 = vrot.lane.b32.xlu1 %v156_v33, %s741_s0  ;;  %193 = vrot.lane.b32.xlu0 %v157_v38, %s741_s0  ;;  %v111_v43 = vsel %vm103_vm0, 0.0, %v70_v40 }
  0x8f   :  { %v127_v44 = vsel %vm120_vm1, %v110_v42, 0.0  ;;  %v128_v45 = vsel %vm120_vm1, %v111_v43, 0.0 }
  0x90   :  { %v159_v46 = vmul.f32 0.5, %v127_v44  ;;  %v160_v49 = vmul.f32 0.5, %v128_v45  ;;  %v143_v23 = vmul.f32 0.25, %v127_v44  ;;  %v144_v21 = vmul.f32 0.25, %v128_v45 }
  0x91   :  { %v72_v47 = vpop.permute.xlu0 %71  ;;  %v74_v48 = vpop.permute.xlu1 %73 }
  0x92   :  { %v112_v50 = vsel %vm103_vm0, 0.0, %v72_v47  ;;  %195 = vrot.lane.b32.xlu1 %v158_v41, %s741_s0  ;;  %197 = vrot.lane.b32.xlu0 %v159_v46, %s741_s0  ;;  %v113_v51 = vsel %vm103_vm0, 0.0, %v74_v48 }
  0x93   :  { %v129_v52 = vsel %vm120_vm1, %v112_v50, 0.0  ;;  %v130_v53 = vsel %vm120_vm1, %v113_v51, 0.0 }
  0x94   :  { %v161_v54 = vmul.f32 0.5, %v129_v52  ;;  %v162_v57 = vmul.f32 0.5, %v130_v53  ;;  %v145_v24 = vmul.f32 0.25, %v129_v52  ;;  %v146_v25 = vmul.f32 0.25, %v130_v53 }
  0x95   :  { %v76_v55 = vpop.permute.xlu0 %75  ;;  %v78_v56 = vpop.permute.xlu1 %77 }
  0x96   :  { %v114_v58 = vsel %vm103_vm0, 0.0, %v76_v55  ;;  %199 = vrot.lane.b32.xlu1 %v160_v49, %s741_s0  ;;  %201 = vrot.lane.b32.xlu0 %v161_v54, %s741_s0  ;;  %v115_v59 = vsel %vm103_vm0, 0.0, %v78_v56 }
  0x97   :  { %v131_v60 = vsel %vm120_vm1, %v114_v58, 0.0  ;;  %v132_v61 = vsel %vm120_vm1, %v115_v59, 0.0 }
  0x98   :  { %v163_v62 = vmul.f32 0.5, %v131_v60  ;;  %v164_v1 = vmul.f32 0.5, %v132_v61  ;;  %v147_v26 = vmul.f32 0.25, %v131_v60  ;;  %v148_v27 = vmul.f32 0.25, %v132_v61 }
  0x99   :  { %v80_v63 = vpop.permute.xlu0 %79  ;;  %v82_v0 = vpop.permute.xlu1 %81 }
  0x9a   :  { %v116_v2 = vsel %vm103_vm0, 0.0, %v80_v63  ;;  %203 = vrot.lane.b32.xlu1 %v162_v57, %s741_s0  ;;  %205 = vrot.lane.b32.xlu0 %v163_v62, %s741_s0  ;;  %v117_v3 = vsel %vm103_vm0, 0.0, %v82_v0 }
  0x9b   :  { %v133_v4 = vsel %vm120_vm1, %v116_v2, 0.0  ;;  %v134_v5 = vsel %vm120_vm1, %v117_v3, 0.0 }
  0x9c   :  { %v165_v6 = vmul.f32 0.5, %v133_v4  ;;  %v166_v9 = vmul.f32 0.5, %v134_v5  ;;  %v149_v28 = vmul.f32 0.25, %v133_v4  ;;  %v150_v29 = vmul.f32 0.25, %v134_v5 }
  0x9d   :  { %v84_v7 = vpop.permute.xlu0 %83  ;;  %v86_v8 = vpop.permute.xlu1 %85 }
  0x9e   :  { %v118_v10 = vsel %vm103_vm0, 0.0, %v84_v7  ;;  %207 = vrot.lane.b32.xlu1 %v164_v1, %s741_s0  ;;  %209 = vrot.lane.b32.xlu0 %v165_v6, %s741_s0  ;;  %v119_v11 = vsel %vm103_vm0, 0.0, %v86_v8 }
  0x9f   :  { %v135_v12 = vsel %vm120_vm1, %v118_v10, 0.0  ;;  %v136_v13 = vsel %vm120_vm1, %v119_v11, 0.0 }
  0xa0   :  { %v167_v14 = vmul.f32 0.5, %v135_v12  ;;  %v168_v15 = vmul.f32 0.5, %v136_v13  ;;  %v151_v30 = vmul.f32 0.25, %v135_v12  ;;  %v847_v31 = vmul.f32 0.25, %v136_v13 }
  0xa2   :  { %211 = vrot.lane.b32.xlu1 %v166_v9, %s741_s0  ;;  %213 = vrot.lane.b32.xlu0 %v167_v14, %s741_s0 }
  0xa6   :  { %215 = vrot.lane.b32.xlu1 %v168_v15, %s741_s0  ;;  %265 = vrot.lane.b32.xlu0 %v137_v16, %s742_s14 }
  0xaa   :  { %267 = vrot.lane.b32.xlu1 %v138_v18, %s742_s14  ;;  %269 = vrot.lane.b32.xlu0 %v139_v17, %s742_s14 }
  0xae   :  { %271 = vrot.lane.b32.xlu1 %v140_v19, %s742_s14  ;;  %273 = vrot.lane.b32.xlu0 %v141_v22, %s742_s14 }
  0xb2   :  { %275 = vrot.lane.b32.xlu1 %v142_v20, %s742_s14  ;;  %277 = vrot.lane.b32.xlu0 %v143_v23, %s742_s14 }
  0xb6   :  { %279 = vrot.lane.b32.xlu1 %v144_v21, %s742_s14  ;;  %281 = vrot.lane.b32.xlu0 %v145_v24, %s742_s14 }
  0xba   :  { %283 = vrot.lane.b32.xlu1 %v146_v25, %s742_s14  ;;  %285 = vrot.lane.b32.xlu0 %v147_v26, %s742_s14 }
  0xbe   :  { %287 = vrot.lane.b32.xlu1 %v148_v27, %s742_s14  ;;  %289 = vrot.lane.b32.xlu0 %v149_v28, %s742_s14 }
  0xc2   :  { %291 = vrot.lane.b32.xlu1 %v150_v29, %s742_s14  ;;  %293 = vrot.lane.b32.xlu0 %v151_v30, %s742_s14 }
  0xc6   :  { %295 = vrot.lane.b32.xlu1 %v847_v31, %s742_s14 }
  0xf8   :  { %v186_v32 = vpop.permute.xlu0 %185 }
  0xf9   :  { %v233_v47 = vadd.f32 %v186_v32, %v137_v16 }
  0xfc   :  { %v188_v33 = vpop.permute.xlu1 %187  ;;  %v190_v34 = vpop.permute.xlu0 %189 }
  0xfd   :  { %v234_v51 = vadd.f32 %v188_v33, %v138_v18  ;;  %v235_v52 = vadd.f32 %v190_v34, %v139_v17 }
 0x100   :  { %v192_v35 = vpop.permute.xlu1 %191  ;;  %v194_v36 = vpop.permute.xlu0 %193 }
 0x101   :  { %v236_v53 = vadd.f32 %v192_v35, %v140_v19  ;;  %v237_v55 = vadd.f32 %v194_v36, %v141_v22 }
 0x104   :  { %v196_v37 = vpop.permute.xlu1 %195  ;;  %v198_v38 = vpop.permute.xlu0 %197 }
 0x105   :  { %v238_v56 = vadd.f32 %v196_v37, %v142_v20  ;;  %v853_v57 = vadd.f32 %v198_v38, %v143_v23 }
 0x108   :  { %v200_v39 = vpop.permute.xlu1 %199  ;;  %v202_v40 = vpop.permute.xlu0 %201 }
 0x109   :  { %v855_v58 = vadd.f32 %v200_v39, %v144_v21  ;;  %v857_v61 = vadd.f32 %v202_v40, %v145_v24 }
 0x10c   :  { %v204_v41 = vpop.permute.xlu1 %203  ;;  %v206_v42 = vpop.permute.xlu0 %205 }
 0x10d   :  { %v860_v1 = vadd.f32 %v204_v41, %v146_v25  ;;  %v862_v2 = vadd.f32 %v206_v42, %v147_v26 }
 0x110   :  { %v208_v43 = vpop.permute.xlu1 %207  ;;  %v210_v44 = vpop.permute.xlu0 %209 }
 0x111   :  { %v864_v5 = vadd.f32 %v208_v43, %v148_v27  ;;  %v866_v6 = vadd.f32 %v210_v44, %v149_v28 }
 0x114   :  { %v212_v45 = vpop.permute.xlu1 %211  ;;  %v214_v46 = vpop.permute.xlu0 %213 }
 0x115   :  { %v868_v9 = vadd.f32 %v212_v45, %v150_v29  ;;  %v870_v10 = vadd.f32 %v214_v46, %v151_v30 }
 0x118   :  { %v851_v48 = vpop.permute.xlu1 %215  ;;  %v266_v49 = vpop.permute.xlu0 %265 }
 0x119   :  { %v313_v50 = vadd.f32 %v266_v49, %v233_v47 }
 0x11b   :  { %v346_v54 = vrot.slane %v313_v50, 7 }
 0x11c   :  { %v268_v59 = vpop.permute.xlu1 %267  ;;  %v270_v60 = vpop.permute.xlu0 %269 }
 0x11d   :  { %v394_v62 = vsel %vm345_vm2, 0.0, %v346_v54  ;;  %v314_v63 = vadd.f32 %v268_v59, %v234_v51  ;;  %v315_v0 = vadd.f32 %v270_v60, %v235_v52 }
 0x11e   :  { %v410_v3 = vmul.f32 0.25, %v394_v62  ;;  %v426_v4 = vmul.f32 0.5, %v394_v62 }
 0x11f   :  { %v347_v7 = vrot.slane %v314_v63, 7  ;;  %v349_v8 = vrot.slane %v315_v0, 7 }
 0x120   :  { %v475_v11 = vrot.slane %v426_v4, 1  ;;  %v580_v12 = vrot.slane %v410_v3, 2  ;;  %v272_v13 = vpop.permute.xlu1 %271  ;;  %v274_v14 = vpop.permute.xlu0 %273 }
 0x121   :  { %v348_v15 = vsel %vm345_vm2, %v346_v54, %v347_v7  ;;  %v402_v16 = vsel %vm345_vm2, %v347_v7, 0.0  ;;  %v395_v17 = vsel %vm345_vm2, 0.0, %v349_v8  ;;  %v316_v18 = vadd.f32 %v272_v13, %v236_v53 }
 0x122   :  { %v411_v19 = vmul.f32 0.25, %v348_v15  ;;  %v427_v22 = vmul.f32 0.5, %v348_v15  ;;  %v428_v20 = vmul.f32 0.5, %v402_v16  ;;  %v547_v23 = vmul.f32 0.25, %v402_v16 }
 0x123   :  { %v412_v21 = vmul.f32 0.25, %v395_v17  ;;  %v429_v24 = vmul.f32 0.5, %v395_v17  ;;  %v350_v25 = vrot.slane %v316_v18, 7  ;;  %v317_v26 = vadd.f32 %v274_v14, %v237_v55 }
 0x124   :  { %v476_v27 = vrot.slane %v427_v22, 1  ;;  %v478_v28 = vrot.slane %v428_v20, 1  ;;  %v581_v29 = vrot.slane %v411_v19, 2  ;;  %v583_v30 = vrot.slane %v547_v23, 2  ;;  %v276_v32 = vpop.permute.xlu1 %275  ;;  %v278_v45 = vpop.permute.xlu0 %277 }
 0x125   :  { %v480_v33 = vrot.slane %v429_v24, 1  ;;  %v585_v34 = vrot.slane %v412_v21, 2  ;;  %v351_v35 = vsel %vm345_vm2, %v349_v8, %v350_v25  ;;  %v403_v36 = vsel %vm345_vm2, %v350_v25, 0.0 }
 0x126   :  { %v477_v37 = vsel %vm474_vm3, %v475_v11, %v476_v27  ;;  %v479_v38 = vsel %vm474_vm3, %v476_v27, %v478_v28  ;;  %v582_v39 = vsel %vm579_vm4, %v580_v12, %v581_v29  ;;  %v584_v40 = vsel %vm579_vm4, %v581_v29, %v583_v30 }
 0x127   :  { %v531_v41 = vadd.f32 %v477_v37, %v410_v3  ;;  %v532_v42 = vadd.f32 %v479_v38, %v411_v19  ;;  %v413_v43 = vmul.f32 0.25, %v351_v35  ;;  %v430_v44 = vmul.f32 0.5, %v351_v35 }
 0x128   :  { %v431_v46 = vmul.f32 0.5, %v403_v36  ;;  %v548_v47 = vmul.f32 0.25, %v403_v36  ;;  %v352_v49 = vrot.slane %v317_v26, 7  ;;  %v318_v50 = vadd.f32 %v276_v32, %v238_v56  ;;  %v280_v51 = vpop.permute.xlu1 %279  ;;  %v282_v17 = vpop.permute.xlu0 %281 }
 0x129   :  { %v636_v52 = vadd.f32 %v582_v39, %v531_v41  ;;  %v637_v53 = vadd.f32 %v584_v40, %v532_v42  ;;  %v481_v54 = vrot.slane %v430_v44, 1  ;;  %v586_v55 = vrot.slane %v413_v43, 2 }
 0x12a   :  { %v483_v59 = vrot.slane %v431_v46, 1  ;;  %v588_v60 = vrot.slane %v548_v47, 2  ;;  %v396_v62 = vsel %vm345_vm2, 0.0, %v352_v49  ;;  %v353_v63 = vrot.slane %v318_v50, 7 }
 0x12b   :  { %653 = vst.msk [vmem:[#allocation5] sm:$0xff] %vm652_vm5, %v636_v52  ;;  %654 = vst.msk [vmem:[#allocation5 + $0x8] sm:$0xff] %vm652_vm5, %v637_v53  ;;  %v482_v0 = vsel %vm474_vm3, %v480_v33, %v481_v54  ;;  %v587_v3 = vsel %vm579_vm4, %v585_v34, %v586_v55  ;;  %v414_v4 = vmul.f32 0.25, %v396_v62  ;;  %v432_v56 = vmul.f32 0.5, %v396_v62 }
 0x12c   :  { %v484_v7 = vsel %vm474_vm3, %v481_v54, %v483_v59  ;;  %v533_v8 = vadd.f32 %v482_v0, %v412_v21  ;;  %v589_v11 = vsel %vm579_vm4, %v586_v55, %v588_v60  ;;  %v354_v12 = vsel %vm345_vm2, %v352_v49, %v353_v63  ;;  %v284_v23 = vpop.permute.xlu1 %283  ;;  %v286_v49 = vpop.permute.xlu0 %285 }
 0x12d   :  { %v534_v13 = vadd.f32 %v484_v7, %v413_v43  ;;  %v485_v14 = vrot.slane %v432_v56, 1  ;;  %v590_v15 = vrot.slane %v414_v4, 2  ;;  %v404_v16 = vsel %vm345_vm2, %v353_v63, 0.0 }
 0x12e   :  { %v638_v18 = vadd.f32 %v587_v3, %v533_v8  ;;  %v415_v19 = vmul.f32 0.25, %v354_v12  ;;  %v433_v22 = vmul.f32 0.5, %v354_v12  ;;  %v434_v20 = vmul.f32 0.5, %v404_v16 }
 0x12f   :  { %v639_v24 = vadd.f32 %v589_v11, %v534_v13  ;;  %v549_v25 = vmul.f32 0.25, %v404_v16  ;;  %v319_v26 = vadd.f32 %v278_v45, %v853_v57  ;;  %v320_v21 = vadd.f32 %v280_v51, %v855_v58 }
 0x130   :  { %655 = vst.msk [vmem:[#allocation5 + $0x10] sm:$0xff] %vm652_vm5, %v638_v18  ;;  %v486_v27 = vrot.slane %v433_v22, 1  ;;  %v488_v28 = vrot.slane %v434_v20, 1  ;;  %v591_v29 = vrot.slane %v415_v19, 2  ;;  %v321_v30 = vadd.f32 %v282_v17, %v857_v61  ;;  %v288_v54 = vpop.permute.xlu1 %287  ;;  %v290_v22 = vpop.permute.xlu0 %289 }
 0x131   :  { %656 = vst.msk [vmem:[#allocation5 + $0x18] sm:$0xff] %vm652_vm5, %v639_v24  ;;  %v593_v32 = vrot.slane %v549_v25, 2  ;;  %v355_v33 = vrot.slane %v319_v26, 7  ;;  %v356_v34 = vrot.slane %v320_v21, 7  ;;  %v322_v35 = vadd.f32 %v284_v23, %v860_v1 }
 0x132   :  { %v487_v36 = vsel %vm474_vm3, %v485_v14, %v486_v27  ;;  %v489_v57 = vsel %vm474_vm3, %v486_v27, %v488_v28  ;;  %v592_v58 = vsel %vm579_vm4, %v590_v15, %v591_v29  ;;  %v358_v37 = vrot.slane %v321_v30, 7 }
 0x133   :  { %v535_v38 = vadd.f32 %v487_v36, %v414_v4  ;;  %v536_v39 = vadd.f32 %v489_v57, %v415_v19  ;;  %v594_v40 = vsel %vm579_vm4, %v591_v29, %v593_v32  ;;  %v397_v61 = vsel %vm345_vm2, 0.0, %v355_v33 }
 0x134   :  { %v416_v41 = vmul.f32 0.25, %v397_v61  ;;  %v435_v42 = vmul.f32 0.5, %v397_v61  ;;  %v357_v43 = vsel %vm345_vm2, %v355_v33, %v356_v34  ;;  %v405_v44 = vsel %vm345_vm2, %v356_v34, 0.0  ;;  %v292_v26 = vpop.permute.xlu1 %291 }
 0x135   :  { %v640_v1 = vadd.f32 %v592_v58, %v535_v38  ;;  %v641_v45 = vadd.f32 %v594_v40, %v536_v39  ;;  %v417_v46 = vmul.f32 0.25, %v357_v43  ;;  %v436_v47 = vmul.f32 0.5, %v357_v43 }
 0x136   :  { %v490_v50 = vrot.slane %v435_v42, 1  ;;  %v595_v51 = vrot.slane %v416_v41, 2  ;;  %v437_v52 = vmul.f32 0.5, %v405_v44  ;;  %v550_v53 = vmul.f32 0.25, %v405_v44 }
 0x137   :  { %657 = vst.msk [vmem:[#allocation5 + $0x20] sm:$0xff] %vm652_vm5, %v640_v1  ;;  %658 = vst.msk [vmem:[#allocation5 + $0x28] sm:$0xff] %vm652_vm5, %v641_v45  ;;  %v491_v55 = vrot.slane %v436_v47, 1  ;;  %v596_v59 = vrot.slane %v417_v46, 2  ;;  %v398_v60 = vsel %vm345_vm2, 0.0, %v358_v37  ;;  %v359_v62 = vrot.slane %v322_v35, 7  ;;  %v294_v1 = vpop.permute.xlu0 %293 }
 0x138   :  { %v493_v63 = vrot.slane %v437_v52, 1  ;;  %v598_v0 = vrot.slane %v550_v53, 2  ;;  %v418_v3 = vmul.f32 0.25, %v398_v60  ;;  %v438_v4 = vmul.f32 0.5, %v398_v60 }
 0x139   :  { %v492_v56 = vsel %vm474_vm3, %v490_v50, %v491_v55  ;;  %v597_v7 = vsel %vm579_vm4, %v595_v51, %v596_v59  ;;  %v360_v8 = vsel %vm345_vm2, %v358_v37, %v359_v62  ;;  %v406_v11 = vsel %vm345_vm2, %v359_v62, 0.0 }
 0x13a   :  { %v494_v12 = vsel %vm474_vm3, %v491_v55, %v493_v63  ;;  %v537_v13 = vadd.f32 %v492_v56, %v416_v41  ;;  %v599_v14 = vsel %vm579_vm4, %v596_v59, %v598_v0  ;;  %v495_v15 = vrot.slane %v438_v4, 1 }
 0x13b   :  { %v538_v16 = vadd.f32 %v494_v12, %v417_v46  ;;  %v600_v17 = vrot.slane %v418_v3, 2  ;;  %v419_v18 = vmul.f32 0.25, %v360_v8  ;;  %v439_v19 = vmul.f32 0.5, %v360_v8 }
 0x13c   :  { %v642_v20 = vadd.f32 %v597_v7, %v537_v13  ;;  %v440_v23 = vmul.f32 0.5, %v406_v11  ;;  %v551_v24 = vmul.f32 0.25, %v406_v11  ;;  %v323_v25 = vadd.f32 %v286_v49, %v862_v2  ;;  %v296_v49 = vpop.permute.xlu1 %295 }
 0x13d   :  { %v643_v21 = vadd.f32 %v599_v14, %v538_v16  ;;  %v496_v27 = vrot.slane %v439_v19, 1  ;;  %v601_v28 = vrot.slane %v419_v18, 2  ;;  %v324_v29 = vadd.f32 %v288_v54, %v864_v5 }
 0x13e   :  { %659 = vst.msk [vmem:[#allocation5 + $0x30] sm:$0xff] %vm652_vm5, %v642_v20  ;;  %v498_v30 = vrot.slane %v440_v23, 1  ;;  %v603_v32 = vrot.slane %v551_v24, 2  ;;  %v361_v33 = vrot.slane %v323_v25, 7  ;;  %v325_v34 = vadd.f32 %v290_v22, %v866_v6 }
 0x13f   :  { %660 = vst.msk [vmem:[#allocation5 + $0x38] sm:$0xff] %vm652_vm5, %v643_v21  ;;  %v497_v35 = vsel %vm474_vm3, %v495_v15, %v496_v27  ;;  %v602_v36 = vsel %vm579_vm4, %v600_v17, %v601_v28  ;;  %v362_v2 = vrot.slane %v324_v29, 7  ;;  %v326_v57 = vadd.f32 %v292_v26, %v868_v9 }
 0x140   :  { %v499_v58 = vsel %vm474_vm3, %v496_v27, %v498_v30  ;;  %v539_v37 = vadd.f32 %v497_v35, %v418_v3  ;;  %v604_v5 = vsel %vm579_vm4, %v601_v28, %v603_v32  ;;  %v399_v38 = vsel %vm345_vm2, 0.0, %v361_v33 }
 0x141   :  { %v540_v39 = vadd.f32 %v499_v58, %v419_v18  ;;  %v420_v40 = vmul.f32 0.25, %v399_v38  ;;  %v441_v61 = vmul.f32 0.5, %v399_v38  ;;  %v363_v6 = vsel %vm345_vm2, %v361_v33, %v362_v2 }
 0x142   :  { %v644_v41 = vadd.f32 %v602_v36, %v539_v37  ;;  %v407_v42 = vsel %vm345_vm2, %v362_v2, 0.0  ;;  %v421_v43 = vmul.f32 0.25, %v363_v6  ;;  %v442_v44 = vmul.f32 0.5, %v363_v6 }
 0x143   :  { %v248_v9 = vadd.f32 %v851_v48, %v847_v31  ;;  %v645_v45 = vadd.f32 %v604_v5, %v540_v39  ;;  %v500_v46 = vrot.slane %v441_v61, 1  ;;  %v443_v47 = vmul.f32 0.5, %v407_v42 }
 0x144   :  { %661 = vst.msk [vmem:[#allocation5 + $0x40] sm:$0xff] %vm652_vm5, %v644_v41  ;;  %v501_v50 = vrot.slane %v442_v44, 1  ;;  %v552_v51 = vmul.f32 0.25, %v407_v42  ;;  %v606_v52 = vrot.slane %v421_v43, 2  ;;  %v364_v53 = vrot.slane %v325_v34, 7 }
 0x145   :  { %662 = vst.msk [vmem:[#allocation5 + $0x48] sm:$0xff] %vm652_vm5, %v645_v45  ;;  %v605_v54 = vrot.slane %v420_v40, 2  ;;  %v503_v55 = vrot.slane %v443_v47, 1  ;;  %v365_v59 = vrot.slane %v326_v57, 7  ;;  %v327_v60 = vadd.f32 %v294_v1, %v870_v10 }
 0x146   :  { %v502_v62 = vsel %vm474_vm3, %v500_v46, %v501_v50  ;;  %v608_v31 = vrot.slane %v552_v51, 2  ;;  %v400_v48 = vsel %vm345_vm2, 0.0, %v364_v53  ;;  %v328_v63 = vadd.f32 %v296_v49, %v248_v9 }
 0x147   :  { %v504_v0 = vsel %vm474_vm3, %v501_v50, %v503_v55  ;;  %v541_v3 = vadd.f32 %v502_v62, %v420_v40  ;;  %v607_v4 = vsel %vm579_vm4, %v605_v54, %v606_v52  ;;  %v444_v56 = vmul.f32 0.5, %v400_v48 }
 0x148   :  { %v542_v7 = vadd.f32 %v504_v0, %v421_v43  ;;  %v422_v8 = vmul.f32 0.25, %v400_v48  ;;  %v366_v11 = vsel %vm345_vm2, %v364_v53, %v365_v59  ;;  %v408_v12 = vsel %vm345_vm2, %v365_v59, 0.0 }
 0x149   :  { %v609_v10 = vsel %vm579_vm4, %v606_v52, %v608_v31  ;;  %v646_v13 = vadd.f32 %v607_v4, %v541_v3  ;;  %v423_v14 = vmul.f32 0.25, %v366_v11  ;;  %v445_v16 = vmul.f32 0.5, %v366_v11 }
 0x14a   :  { %v647_v15 = vadd.f32 %v609_v10, %v542_v7  ;;  %v446_v17 = vmul.f32 0.5, %v408_v12  ;;  %v553_v18 = vmul.f32 0.25, %v408_v12  ;;  %v505_v19 = vrot.slane %v444_v56, 1 }
 0x14b   :  { %663 = vst.msk [vmem:[#allocation5 + $0x50] sm:$0xff] %vm652_vm5, %v646_v13  ;;  %v611_v22 = vrot.slane %v423_v14, 2  ;;  %v367_v20 = vrot.slane %v327_v60, 7  ;;  %v368_v23 = vrot.slane %v328_v63, 7  ;;  %v610_v24 = vrot.slane %v422_v8, 2 }
 0x14c   :  { %664 = vst.msk [vmem:[#allocation5 + $0x58] sm:$0xff] %vm652_vm5, %v647_v15  ;;  %v506_v25 = vrot.slane %v445_v16, 1  ;;  %v508_v26 = vrot.slane %v446_v17, 1  ;;  %v613_v21 = vrot.slane %v553_v18, 2 }
 0x14d   :  { %v401_v27 = vsel %vm345_vm2, 0.0, %v367_v20  ;;  %v369_v28 = vsel %vm345_vm2, %v367_v20, %v368_v23  ;;  %v409_v29 = vsel %vm345_vm2, %v368_v23, 0.0  ;;  %v612_v33 = vsel %vm579_vm4, %v610_v24, %v611_v22 }
 0x14e   :  { %v507_v30 = vsel %vm474_vm3, %v505_v19, %v506_v25  ;;  %v509_v32 = vsel %vm474_vm3, %v506_v25, %v508_v26  ;;  %v614_v34 = vsel %vm579_vm4, %v611_v22, %v613_v21  ;;  %v447_v2 = vmul.f32 0.5, %v401_v27 }
 0x14f   :  { %v543_v35 = vadd.f32 %v507_v30, %v422_v8  ;;  %v544_v36 = vadd.f32 %v509_v32, %v423_v14  ;;  %v425_v57 = vmul.f32 0.25, %v369_v28  ;;  %v424_v58 = vmul.f32 0.25, %v401_v27 }
 0x150   :  { %v448_v37 = vmul.f32 0.5, %v369_v28  ;;  %v449_v5 = vmul.f32 0.5, %v409_v29  ;;  %v554_v38 = vmul.f32 0.25, %v409_v29  ;;  %v510_v61 = vrot.slane %v447_v2, 1 }
 0x151   :  { %v648_v39 = vadd.f32 %v612_v33, %v543_v35  ;;  %v649_v40 = vadd.f32 %v614_v34, %v544_v36  ;;  %v616_v42 = vrot.slane %v425_v57, 2  ;;  %v615_v44 = vrot.slane %v424_v58, 2 }
 0x152   :  { %v511_v6 = vrot.slane %v448_v37, 1  ;;  %v513_v41 = vrot.slane %v449_v5, 1  ;;  %v618_v43 = vrot.slane %v554_v38, 2 }
 0x153   :  { %665 = vst.msk [vmem:[#allocation5 + $0x60] sm:$0xff] %vm652_vm5, %v648_v39  ;;  %666 = vst.msk [vmem:[#allocation5 + $0x68] sm:$0xff] %vm652_vm5, %v649_v40  ;;  %v617_v47 = vsel %vm579_vm4, %v615_v44, %v616_v42 }
 0x154   :  { %v512_v1 = vsel %vm474_vm3, %v510_v61, %v511_v6  ;;  %v514_v9 = vsel %vm474_vm3, %v511_v6, %v513_v41  ;;  %v619_v49 = vsel %vm579_vm4, %v616_v42, %v618_v43 }
 0x155   :  { %v545_v45 = vadd.f32 %v512_v1, %v424_v58  ;;  %v546_v46 = vadd.f32 %v514_v9, %v425_v57 }
 0x157   :  { %v650_v50 = vadd.f32 %v617_v47, %v545_v45  ;;  %v651_v51 = vadd.f32 %v619_v49, %v546_v46 }
 0x159   :  { %667 = vst.msk [vmem:[#allocation5 + $0x70] sm:$0xff] %vm652_vm5, %v650_v50  ;;  %668 = vst.msk [vmem:[#allocation5 + $0x78] sm:$0xff] %vm652_vm5, %v651_v51 }
 0x15a   :  { %724 = shalt.err (!%p721_p9)
}
 0x15b   :  { %680 = dma.vmem_to_hbm [thread:$0]  %s675_s16, 2048, %s961_s1, [#allocation4], %s738_s9, %s738_s9, %s739_s10  }
 0x15c   :  { %735 = dma.done.wait [#allocation4], 2048  }
 0x15d   :  { %736 = vsyncadd [#allocation4], 4294965248 }
 0x15e   :  { %684 = vsyncpa [#allocation3], 1 }
 0x15f   :  { %685 = vsyncpa [#allocation4], 1 }

</bundles_post_ra>
